<compile_context>
chip_gen: v7x
topology: tpu7x:2x2x1
jax: 0.10.0
libtpu: 0.0.40
codegen_flags: <defaults>
</compile_context>

<pallas_src>
import functools

import numpy as np
import jax
import jax.numpy as jnp
from jax.experimental import pallas as pl
from jax.experimental.pallas import tpu as pltpu


def _round_up(v, m):
    return ((v + m - 1) // m) * m


# --------------------------------------------------------------------------- #
# Kernels
# --------------------------------------------------------------------------- #
def _fourier_packed_kernel(x_ref, fmask_ref, sel_ref, out_ref, *, k):
    """k logical rows packed per 128-lane kernel row (lane-dense, C < 128).

    x_ref:     (TILE_ROWS, k)    k scalars (= k logical rows) per kernel row
    fmask_ref: (k, k*C)          row j: freqs [f|f] in lane-block j, 0 elsewhere
    sel_ref:   (1, k*C)          0.0 on cos lanes, 1.0 on sin lanes
    out_ref:   (TILE_ROWS, k*C)  row-major identical to k rows of (N, C)
    """
    x = x_ref[...].astype(jnp.float32)           # (TR, k)
    fm = fmask_ref[...].astype(jnp.float32)      # (k, W)
    # proj[r, j*C + m] = x[r, j] * f_row[m]; terms with j' != j multiply an
    # exact 0, so the sum is bit-exact and needs no cross-lane movement (VPU).
    proj = x[:, 0:1] * fm[0:1, :]
    for j in range(1, k):
        proj = proj + x[:, j:j + 1] * fm[j:j + 1, :]
    cos_v = jnp.cos(proj)
    sin_v = jnp.sin(proj)
    sel = sel_ref[...].astype(jnp.float32)       # (1, W) exact 0/1 blend mask
    out = cos_v + (sin_v - cos_v) * sel
    out_ref[...] = out.astype(out_ref.dtype)     # single unmasked 128-lane store


def _fourier_simple_kernel(x_ref, f_ref, out_ref, *, c_half):
    """Unpacked fallback (C >= 128, or N not divisible by the packing factor)."""
    x = x_ref[...].astype(jnp.float32)           # (TR, 1)
    f = f_ref[...].astype(jnp.float32)           # (1, C/2)
    proj = x * f                                 # broadcast outer product (VPU)
    cos_v = jnp.cos(proj)
    sin_v = jnp.sin(proj)
    if c_half % 128 == 0:
        # vreg-aligned halves: two static-slice stores, no concat temporary.
        out_ref[:, :c_half] = cos_v.astype(out_ref.dtype)
        out_ref[:, c_half:] = sin_v.astype(out_ref.dtype)
    else:
        out_ref[...] = jnp.concatenate([cos_v, sin_v], axis=1).astype(out_ref.dtype)


# --------------------------------------------------------------------------- #
# Init-time parameter folding (mirrors register_buffer + (2*pi*freqs).to(dtype))
# --------------------------------------------------------------------------- #
def make_fourier_params(freqs, dtype=jnp.float32):
    """Fold 2*pi + dtype cast once; precompute lane-packing tables for C < 128."""
    fs = (2.0 * np.pi * freqs).astype(dtype)          # (C/2,)
    c_half = fs.shape[0]
    c = 2 * c_half
    params = {"freqs_scaled": fs, "c_half": c_half, "k_max": 1,
              "fmask": None, "sel": None}
    if c < 128 and 128 % c == 0:
        k = 128 // c
        f_row = jnp.concatenate([fs, fs]).astype(jnp.float32)                # (C,)
        # Block-diagonal frequency rows: fmask[j, j*C:(j+1)*C] = [f|f], else 0.
        fmask = jnp.kron(jnp.eye(k, dtype=jnp.float32), f_row[None, :])      # (k, k*C)
        sel = jnp.tile(
            jnp.concatenate([jnp.zeros((c_half,), jnp.float32),
                             jnp.ones((c_half,), jnp.float32)]), k)[None, :]  # (1, k*C)
        params.update(k_max=k, fmask=fmask, sel=sel)
    return params


# --------------------------------------------------------------------------- #
# Tile selection (budgets against lane-padded, double-buffered VMEM footprints)
# --------------------------------------------------------------------------- #
def _pick_tile_rows(n_rows, out_row_bytes, x_row_bytes, override=None,
                    target_out_tile_bytes=2 << 20, vmem_budget_bytes=10 << 20):
    if n_rows <= 8:
        return n_rows                               # single block == full array
    if override is not None:
        tr = override
    else:
        per_row = 2 * (out_row_bytes + x_row_bytes)  # double-buffered in + out
        tr = min(target_out_tile_bytes // max(out_row_bytes, 1),
                 vmem_budget_bytes // max(per_row, 1))
        if n_rows >= 16:
            # >= 2 grid steps so v7x's two TensorCores both get work.
            tr = min(tr, _round_up((n_rows + 1) // 2, 8))
    tr = max(8, min((tr // 8) * 8, (n_rows // 8) * 8))
    return tr


_COMPILER_PARAMS = pltpu.CompilerParams(
    dimension_semantics=("parallel",),
    vmem_limit_bytes=32 * 1024 * 1024,   # explicit; usage stays <= ~10 MiB
)


# --------------------------------------------------------------------------- #
# Forward pass
# --------------------------------------------------------------------------- #
def fourier_embedding(params, x, tile_rows=None):
    """x: (N,) array. Returns (N, C) = [cos(x (2*pi*f)), sin(x (2*pi*f))]."""
    n = x.shape[0]
    c_half = params["c_half"]
    c = 2 * c_half
    itemsize = jnp.dtype(x.dtype).itemsize
    x_row_bytes = 128 * itemsize                    # (rows, k) lane-pads to 128

    k = params["k_max"]
    if k > 1 and n % k == 0:
        # ---------------- lane-dense packed path (C < 128) ---------------- #
        w = k * c                                   # == 128
        n_rows = n // k
        x2 = x.reshape(n_rows, k)                   # free row-major reshape
        out_row_bytes = _round_up(w, 128) * itemsize
        tr = _pick_tile_rows(n_rows, out_row_bytes, x_row_bytes, tile_rows)
        grid = (pl.cdiv(n_rows, tr),)               # ragged last block masked

        out = pl.pallas_call(
            functools.partial(_fourier_packed_kernel, k=k),
            out_shape=jax.ShapeDtypeStruct((n_rows, w), x.dtype),
            grid_spec=pltpu.PrefetchScalarGridSpec(
                num_scalar_prefetch=0,
                grid=grid,
                in_specs=[
                    pl.BlockSpec((tr, k), lambda i: (i, 0)),   # packed x tile
                    pl.BlockSpec((k, w), lambda i: (0, 0)),    # resident freqs
                    pl.BlockSpec((1, w), lambda i: (0, 0)),    # resident selector
                ],
                out_specs=pl.BlockSpec((tr, w), lambda i: (i, 0)),
            ),
            compiler_params=_COMPILER_PARAMS,
        )(x2, params["fmask"], params["sel"])
        return out.reshape(n, c)                    # free row-major reshape

    # ------------------- simple unpacked fallback path -------------------- #
    x2 = x.reshape(n, 1)
    f2 = params["freqs_scaled"].reshape(1, c_half)
    out_row_bytes = _round_up(c, 128) * itemsize
    tr = _pick_tile_rows(n, out_row_bytes, x_row_bytes, tile_rows)
    grid = (pl.cdiv(n, tr),)                        # ragged last block masked

    out = pl.pallas_call(
        functools.partial(_fourier_simple_kernel, c_half=c_half),
        out_shape=jax.ShapeDtypeStruct((n, c), x.dtype),
        grid_spec=pltpu.PrefetchScalarGridSpec(
            num_scalar_prefetch=0,
            grid=grid,
            in_specs=[
                pl.BlockSpec((tr, 1), lambda i: (i, 0)),       # x tile
                pl.BlockSpec((1, c_half), lambda i: (0, 0)),   # resident freqs
            ],
            out_specs=pl.BlockSpec((tr, c), lambda i: (i, 0)),
        ),
        compiler_params=_COMPILER_PARAMS,
    )(x2, f2)
    return out


# --------------------------------------------------------------------------- #
# Self-test
# --------------------------------------------------------------------------- #
if __name__ == "__main__":
    key = jax.random.PRNGKey(0)
    k_freqs, k_x1, k_x2, k_x3, k_f4, k_x4 = jax.random.split(key, 6)

    num_channels = 32
    scale = 16.0

    # Deterministic "buffer" init: freqs = randn(num_channels // 2) * scale.
    freqs = jax.random.normal(k_freqs, (num_channels // 2,), jnp.float32) * scale
    params = make_fourier_params(freqs, jnp.float32)
    fs = params["freqs_scaled"]

    def reference(xv, fsv):
        proj = xv[:, None] * fsv[None, :]
        return jnp.concatenate([jnp.cos(proj), jnp.sin(proj)], axis=1)

    # case 1: the model's actual tiny shape (N=8, C=32) -> packed path, 1 block
    x1 = jax.random.normal(k_x1, (8,), jnp.float32)
    o1 = jax.block_until_ready(fourier_embedding(params, x1))
    assert o1.shape == (8, num_channels)
    np.testing.assert_allclose(np.asarray(o1), np.asarray(reference(x1, fs)),
                               rtol=1e-5, atol=1e-5)

    # case 2: larger N, several grid steps + ragged last block (no pad / slice)
    x2 = jax.random.normal(k_x2, (200,), jnp.float32)
    o2 = jax.block_until_ready(fourier_embedding(params, x2, tile_rows=16))
    assert o2.shape == (200, num_channels)
    np.testing.assert_allclose(np.asarray(o2), np.asarray(reference(x2, fs)),
                               rtol=1e-5, atol=1e-5)

    # case 3: N not divisible by the packing factor -> simple fallback path
    x3 = jax.random.normal(k_x3, (9,), jnp.float32)
    o3 = jax.block_until_ready(fourier_embedding(params, x3))
    assert o3.shape == (9, num_channels)
    np.testing.assert_allclose(np.asarray(o3), np.asarray(reference(x3, fs)),
                               rtol=1e-5, atol=1e-5)

    # case 4: C = 256 -> aligned two-slice store path (no concat), 2 grid steps
    nc4 = 256
    freqs4 = jax.random.normal(k_f4, (nc4 // 2,), jnp.float32) * scale
    params4 = make_fourier_params(freqs4, jnp.float32)
    x4 = jax.random.normal(k_x4, (16,), jnp.float32)
    o4 = jax.block_until_ready(fourier_embedding(params4, x4))
    assert o4.shape == (16, nc4)
    np.testing.assert_allclose(np.asarray(o4),
                               np.asarray(reference(x4, params4["freqs_scaled"])),
                               rtol=1e-5, atol=1e-5)

    print("KERNEL_OK")
</pallas_src>

<mosaic_0001>
module attributes {stable_mosaic.version = 11 : i64} {
  func.func @_fourier_packed_kernel(%arg0: i32, %arg1: memref<2x4xf32, #tpu.memory_space<vmem>>, %arg2: memref<4x128xf32, #tpu.memory_space<vmem>>, %arg3: memref<1x128xf32, #tpu.memory_space<vmem>>, %arg4: memref<2x128xf32, #tpu.memory_space<vmem>>) attributes {dimension_semantics = [#tpu.dimension_semantics<parallel>], iteration_bounds = array<i64: 1>, scalar_prefetch = 0 : i64, scratch_operands = 0 : i64, tpu.core_type = #tpu.core_type<tc>, window_params = [{transform_indices = @transform_0, window_bounds = array<i64: 2, 4>}, {pipeline_mode = #tpu.pipeline_mode<synchronous>, transform_indices = @transform_1, window_bounds = array<i64: 4, 128>}, {pipeline_mode = #tpu.pipeline_mode<synchronous>, transform_indices = @transform_2, window_bounds = array<i64: 1, 128>}, {transform_indices = @transform_3, window_bounds = array<i64: 2, 128>}]} {
    %c0 = arith.constant 0 : index
    %c0_0 = arith.constant 0 : index
    %0 = vector.load %arg1[%c0, %c0_0] : memref<2x4xf32, #tpu.memory_space<vmem>>, vector<2x4xf32>
    %c0_1 = arith.constant 0 : index
    %c0_2 = arith.constant 0 : index
    %1 = vector.load %arg2[%c0_1, %c0_2] : memref<4x128xf32, #tpu.memory_space<vmem>>, vector<4x128xf32>
    %2 = vector.extract_strided_slice %0 {offsets = [0, 0], sizes = [2, 1], strides = [1, 1]} : vector<2x4xf32> to vector<2x1xf32>
    %3 = vector.extract_strided_slice %1 {offsets = [0, 0], sizes = [1, 128], strides = [1, 1]} : vector<4x128xf32> to vector<1x128xf32>
    %4 = vector.broadcast %2 : vector<2x1xf32> to vector<2x128xf32>
    %5 = vector.broadcast %3 : vector<1x128xf32> to vector<2x128xf32>
    %6 = arith.mulf %4, %5 : vector<2x128xf32>
    %7 = vector.extract_strided_slice %0 {offsets = [0, 1], sizes = [2, 1], strides = [1, 1]} : vector<2x4xf32> to vector<2x1xf32>
    %8 = vector.extract_strided_slice %1 {offsets = [1, 0], sizes = [1, 128], strides = [1, 1]} : vector<4x128xf32> to vector<1x128xf32>
    %9 = vector.broadcast %7 : vector<2x1xf32> to vector<2x128xf32>
    %10 = vector.broadcast %8 : vector<1x128xf32> to vector<2x128xf32>
    %11 = arith.mulf %9, %10 : vector<2x128xf32>
    %12 = arith.addf %6, %11 : vector<2x128xf32>
    %13 = vector.extract_strided_slice %0 {offsets = [0, 2], sizes = [2, 1], strides = [1, 1]} : vector<2x4xf32> to vector<2x1xf32>
    %14 = vector.extract_strided_slice %1 {offsets = [2, 0], sizes = [1, 128], strides = [1, 1]} : vector<4x128xf32> to vector<1x128xf32>
    %15 = vector.broadcast %13 : vector<2x1xf32> to vector<2x128xf32>
    %16 = vector.broadcast %14 : vector<1x128xf32> to vector<2x128xf32>
    %17 = arith.mulf %15, %16 : vector<2x128xf32>
    %18 = arith.addf %12, %17 : vector<2x128xf32>
    %19 = vector.extract_strided_slice %0 {offsets = [0, 3], sizes = [2, 1], strides = [1, 1]} : vector<2x4xf32> to vector<2x1xf32>
    %20 = vector.extract_strided_slice %1 {offsets = [3, 0], sizes = [1, 128], strides = [1, 1]} : vector<4x128xf32> to vector<1x128xf32>
    %21 = vector.broadcast %19 : vector<2x1xf32> to vector<2x128xf32>
    %22 = vector.broadcast %20 : vector<1x128xf32> to vector<2x128xf32>
    %23 = arith.mulf %21, %22 : vector<2x128xf32>
    %24 = arith.addf %18, %23 : vector<2x128xf32>
    %25 = math.cos %24 : vector<2x128xf32>
    %26 = math.sin %24 : vector<2x128xf32>
    %c0_3 = arith.constant 0 : index
    %c0_4 = arith.constant 0 : index
    %27 = vector.load %arg3[%c0_3, %c0_4] : memref<1x128xf32, #tpu.memory_space<vmem>>, vector<1x128xf32>
    %28 = arith.subf %26, %25 : vector<2x128xf32>
    %29 = vector.broadcast %27 : vector<1x128xf32> to vector<2x128xf32>
    %30 = arith.mulf %28, %29 : vector<2x128xf32>
    %31 = arith.addf %25, %30 : vector<2x128xf32>
    %c0_5 = arith.constant 0 : index
    %c0_6 = arith.constant 0 : index
    %32 = vector.load %arg4[%c0_5, %c0_6] : memref<2x128xf32, #tpu.memory_space<vmem>>, vector<2x128xf32>
    tpu.vector_store %arg4[%c0_5, %c0_6], %31 {strides = array<i32>} : memref<2x128xf32, #tpu.memory_space<vmem>>, vector<2x128xf32>,
    return
  }
  func.func @transform_0(%arg0: i32) -> (i32, i32) {
    %c0_i32 = arith.constant 0 : i32
    %c0_i32_0 = arith.constant 0 : i32
    return %arg0, %c0_i32 : i32, i32
  }
  func.func @transform_1(%arg0: i32) -> (i32, i32) {
    %c0_i32 = arith.constant 0 : i32
    %c0_i32_0 = arith.constant 0 : i32
    %c0_i32_1 = arith.constant 0 : i32
    return %c0_i32, %c0_i32_0 : i32, i32
  }
  func.func @transform_2(%arg0: i32) -> (i32, i32) {
    %c0_i32 = arith.constant 0 : i32
    %c0_i32_0 = arith.constant 0 : i32
    %c0_i32_1 = arith.constant 0 : i32
    return %c0_i32, %c0_i32_0 : i32, i32
  }
  func.func @transform_3(%arg0: i32) -> (i32, i32) {
    %c0_i32 = arith.constant 0 : i32
    %c0_i32_0 = arith.constant 0 : i32
    return %arg0, %c0_i32 : i32, i32
  }
}

</mosaic_0001>

<bundles_post_ra>
// kernel: tpu_custom_call.1
= control target key start
LH: loop header
LB: loop body
LE: loop exit
PB: predicated region body
PF: predicated region fallthrough
CT: control target
= control target key end

     0   :  { %8 = vsyncpa [#allocation3], 0  ;;  %s515_s0 = inlined_call_operand.hbm [shape: f32[2,4], index: 0, kind: input, shape index: {}]   ;;  %s516_s1 = inlined_call_operand.hbm [shape: f32[4,128], index: 1, kind: input, shape index: {}]   ;;  %s517_s2 = inlined_call_operand.vmem [shape: f32[1,128], index: 2, kind: input, shape index: {}]   ;;  %s518_s3 = inlined_call_operand.hbm [shape: f32[2,128], index: 3, kind: output, shape index: {}]  }
   0x1   :  { %9 = vsyncpa [#allocation6], 0 }
   0x2   :  { %10 = vsyncpa [#allocation4], 0  ;;  %s422_s12 = smov [#allocation2]   ;;  %s423_s14 = smov [#allocation5]  }
   0x3   :  { %s17_s13 = sshll.u32 %s422_s12, 4  ;;  %s27_s15 = sshll.u32 %s423_s14, 4  ;;  %s18_s13 = int_to_ptr.vmem [resolvable:$true] %s17_s13  ;;  %s28_s15 = int_to_ptr.vmem [resolvable:$true] %s27_s15 }
   0x4   :  { %s350_s18 = scalar_lea.hbm %s515_s0, 32 }
   0x5   :  { %p351_p0 = scmp.ne.s32.totalorder %s515_s0, %s350_s18  ;;  %p354_p1 = scmp.lt.u32.totalorder %s350_s18, %s515_s0 }
   0x7   :  { %p356_p2 = pnand %p354_p1, %p351_p0 }
   0x9   :  { %359 = shalt.err (!%p356_p2)
}
   0xa   :  { %s360_s23 = scalar_lea.vmem %s18_s13, 32  ;;  %p365_p4 = scmp.lt.s32.totalorder %s18_s13, %s18_s13 }
   0xb   :  { %p361_p3 = scmp.ne.s32.totalorder %s18_s13, %s360_s23  ;;  %p366_p5 = scmp.lt.s32.totalorder %s360_s23, %s360_s23 }
   0xd   :  { %p367_p6 = por %p366_p5, %p365_p4 }
   0xf   :  { %p368_p7 = pnand %p367_p6, %p361_p3 }
  0x11   :  { %371 = shalt.err (!%p368_p7)
}
  0x12   :  { %20 = dma.hbm_to_vmem [thread:$0]  %s515_s0, 32, %s18_s13, [#allocation3]  }
  0x13   :  { %s372_s28 = scalar_lea.hbm %s516_s1, 64 }
  0x14   :  { %p373_p8 = scmp.ne.s32.totalorder %s516_s1, %s372_s28  ;;  %p376_p9 = scmp.lt.u32.totalorder %s372_s28, %s516_s1 }
  0x16   :  { %p378_p10 = pnand %p376_p9, %p373_p8 }
  0x18   :  { %381 = shalt.err (!%p378_p10)
}
  0x19   :  { %s382_s6 = scalar_lea.vmem %s28_s15, 64  ;;  %p387_p12 = scmp.lt.s32.totalorder %s28_s15, %s28_s15 }
  0x1a   :  { %p383_p11 = scmp.ne.s32.totalorder %s28_s15, %s382_s6  ;;  %p388_p13 = scmp.lt.s32.totalorder %s382_s6, %s382_s6 }
  0x1c   :  { %p389_p0 = por %p388_p13, %p387_p12 }
  0x1e   :  { %p390_p1 = pnand %p389_p0, %p383_p11 }
  0x20   :  { %393 = shalt.err (!%p390_p1)
}
  0x21   :  { %30 = dma.hbm_to_vmem [thread:$0]  %s516_s1, 64, %s28_s15, [#allocation6]  }
  0x22   :  { %416 = dma.done.wait [#allocation3], 32  }
  0x23   :  { %417 = vsyncadd [#allocation3], 4294967264 }
  0x24   :  { %418 = dma.done.wait [#allocation6], 64  }
  0x25   :  { %419 = vsyncadd [#allocation6], 4294967232  ;;  %v424_v0 = vmov 0   ;;  %v425_v1 = vmov 2   ;;  %v39_v2 = vld [vmem:[#allocation2] sm:$0x3]  ;;  %v46_v5 = vlaneseq }
  0x26   :  { %341 = vset.pattern.permute.xlu0 %v424_v0  ;;  %343 = vset.pattern.permute.xlu1 %v425_v1  ;;  %v426_v3 = vmov 1   ;;  %v427_v4 = vmov 3   ;;  %v40_v9 = vld [vmem:[#allocation5] sm:$0xf]  ;;  %v428_v37 = vmov 683565275  }
  0x27   :  { %43 = vperm.xlu0 %341, %v39_v2   ;;  %62 = vperm.xlu1 %343, %v39_v2   ;;  %v47_v6 = vshrl.u32 %v46_v5, 7  ;;  %v429_v39 = vmov 2475754826   ;;  %v430_v42 = vmov 2131351028   ;;  %s434_s9 = smov [#allocation7]  }
  0x28   :  { %v431_v45 = vmov 2102212464   ;;  %v432_v48 = vmov 920167782   ;;  %v433_v51 = vmov 1326507024  }
  0x29   :  { %v48_v7 = vsub.s32 0, %v47_v6  ;;  %v57_v8 = vsub.s32 1, %v47_v6  ;;  %v67_v11 = vsub.s32 2, %v47_v6  ;;  %v77_v13 = vsub.s32 3, %v47_v6  ;;  %s305_s10 = sshll.u32 %s434_s9, 4  ;;  %s306_s10 = int_to_ptr.vmem [resolvable:$true] %s305_s10 }
  0x2a   :  { %s394_s11 = scalar_lea.vmem %s306_s10, 32  ;;  %p399_p3 = scmp.lt.s32.totalorder %s306_s10, %s306_s10 }
  0x2b   :  { %342 = vset.pattern.permute.xlu0 %v426_v3  ;;  %344 = vset.pattern.permute.xlu1 %v427_v4  ;;  %v49_v14 = vrot.slane %v40_v9, %v48_v7  ;;  %v58_v15 = vrot.slane %v40_v9, %v57_v8  ;;  %v68_v16 = vrot.slane %v40_v9, %v67_v11  ;;  %p395_p2 = scmp.ne.s32.totalorder %s306_s10, %s394_s11  ;;  %p400_p4 = scmp.lt.s32.totalorder %s394_s11, %s394_s11 }
  0x2c   :  { %52 = vperm.xlu0 %342, %v39_v2   ;;  %72 = vperm.xlu1 %344, %v39_v2   ;;  %v78_v17 = vrot.slane %v40_v9, %v77_v13 }
  0x2d   :  { %p401_p5 = por %p400_p4, %p399_p3 }
  0x2f   :  { %p402_p6 = pnand %p401_p5, %p395_p2 }
  0x30   :  { %345 = vset.pattern.permute.xlu0 %v427_v4 }
  0xa6   :  { %v44_v10 = vpop.permute.xlu0 %43  ;;  %v63_v12 = vpop.permute.xlu1 %62 }
  0xa7   :  { %v50_v20 = vmul.f32 %v49_v14, %v44_v10  ;;  %v69_v22 = vmul.f32 %v68_v16, %v63_v12 }
  0xab   :  { %v53_v18 = vpop.permute.xlu0 %52  ;;  %v73_v19 = vpop.permute.xlu1 %72 }
  0xac   :  { %v59_v21 = vmul.f32 %v58_v15, %v53_v18  ;;  %v79_v24 = vmul.f32 %v78_v17, %v73_v19 }
  0xae   :  { %v60_v23 = vadd.f32 %v59_v21, %v50_v20 }
  0xb0   :  { %v70_v25 = vadd.f32 %v69_v22, %v60_v23 }
  0xb2   :  { %v479_v26 = vadd.f32 %v79_v24, %v70_v25 }
  0xb4   :  { %v84_v27 = vand.u32 2139095040, %v479_v26  ;;  %v81_v31 = vand.u32 2147483647, %v479_v26  ;;  %vm83_vm7 = vcmp.lt.s32.totalorder %v479_v26, 0  ;;  %vm173_vm15 = vweird.f32 %v479_v26 }
  0xb6   :  { %v85_v28 = vshrl.u32 %v84_v27, 23  ;;  %v88_v34 = vand.u32 8388607, %v81_v31  ;;  %vm82_vm8 = vcmp.le.f32.partialorder %v81_v31, 0.7853982 }
  0xb8   :  { %v315_v29 = vadd.s32 4294967169, %v85_v28  ;;  %v89_v53 = vor.u32 8388608, %v88_v34 }
  0xba   :  { %v91_v30 = vadd.s32 1, %v315_v29  ;;  %v129_v3 = vshll.u32 %v89_v53, 8 }
  0xbc   :  { %vm92_vm0 = vcmp.gt.s32.totalorder %v91_v30, 0 }
  0xbd   :  { %v93_v32 = vsel %vm92_vm0, %v91_v30, 0 }
  0xbe   :  { %v95_v33 = vand.u32 31, %v93_v32  ;;  %v94_v36 = vshrl.u32 %v93_v32, 5 }
  0xc0   :  { %v96_v35 = vsub.s32 32, %v95_v33  ;;  %v98_v38 = vshll.u32 %v428_v37, %v95_v33  ;;  %v101_v40 = vshll.u32 %v429_v39, %v95_v33  ;;  %v104_v44 = vshll.u32 %v430_v42, %v95_v33 }
  0xc1   :  { %v107_v47 = vshll.u32 %v431_v45, %v95_v33  ;;  %v110_v50 = vshll.u32 %v432_v48, %v95_v33  ;;  %vm113_vm1 = vcmp.lt.s32.totalorder %v94_v36, 1  ;;  %vm116_vm2 = vcmp.lt.s32.totalorder %v94_v36, 4 }
  0xc2   :  { %v99_v41 = vshrl.u32 %v429_v39, %v96_v35  ;;  %v102_v43 = vshrl.u32 %v430_v42, %v96_v35  ;;  %v105_v46 = vshrl.u32 %v431_v45, %v96_v35  ;;  %v108_v49 = vshrl.u32 %v432_v48, %v96_v35 }
  0xc3   :  { %v111_v52 = vshrl.u32 %v433_v51, %v96_v35  ;;  %v97_v62 = vshrl.u32 %v428_v37, %v96_v35  ;;  %vm115_vm3 = vcmp.lt.s32.totalorder %v94_v36, 3  ;;  %vm114_vm4 = vcmp.lt.s32.totalorder %v94_v36, 2 }
  0xc4   :  { %v100_v54 = vor.u32 %v99_v41, %v98_v38  ;;  %v103_v55 = vor.u32 %v102_v43, %v101_v40  ;;  %v106_v56 = vor.u32 %v105_v46, %v104_v44  ;;  %v109_v57 = vor.u32 %v108_v49, %v107_v47 }
  0xc5   :  { %v112_v58 = vor.u32 %v111_v52, %v110_v50 }
  0xc6   :  { %v118_v59 = vsel %vm116_vm2, %v106_v56, 2102212464  ;;  %v121_v60 = vsel %vm113_vm1, %v100_v54, %v103_v55  ;;  %v125_v61 = vsel %vm113_vm1, %v103_v55, %v106_v56  ;;  %v122_v63 = vsel %vm116_vm2, %v109_v57, 920167782 }
  0xc7   :  { %v126_v0 = vsel %vm116_vm2, %v112_v58, 1326507024  ;;  %v123_v1 = vsel %vm115_vm3, %v106_v56, %v122_v63  ;;  %v117_v4 = vsel %vm113_vm1, %v97_v62, %v100_v54  ;;  %v119_v5 = vsel %vm115_vm3, %v103_v55, %v118_v59 }
  0xc8   :  { %v127_v2 = vsel %vm115_vm3, %v109_v57, %v126_v0  ;;  %v124_v6 = vsel %vm114_vm4, %v121_v60, %v123_v1  ;;  %v120_v12 = vsel %vm114_vm4, %v117_v4, %v119_v5  ;;  %v323_v60 = vld [vmem:[%s517_s2] ss:$0 sm:$0xff] }
  0xc9   :  { %v128_v7 = vsel %vm114_vm4, %v125_v61, %v127_v2  ;;  %v488_v10 = vmul.u32.u64.low %v129_v3, %v124_v6  ;;  %v489_v11 = vmul.u32.u64.high %v129_v3, %v124_v6, %v488_v10  ;;  %v136_v14 = vmul.u32 %v129_v3, %v120_v12 }
  0xca   :  { %v485_v8 = vmul.u32.u64.low %v129_v3, %v128_v7  ;;  %v486_v9 = vmul.u32.u64.high %v129_v3, %v128_v7, %v485_v8 }
  0xcb   :  { %v139_v13 = vadd.s32 1, %v489_v11 }
  0xcc   :  { %vm138_vm5 = vc.u32 %v486_v9, %v488_v10  ;;  %v137_v27 = vadd.s32 %v488_v10, %v486_v9 }
  0xcd   :  { %v140_v15 = vsel %vm138_vm5, %v139_v13, %v489_v11 }
  0xce   :  { %v141_v16 = vadd.s32 %v140_v15, %v136_v14 }
  0xd0   :  { %v142_v17 = vadd.s32 536870912, %v141_v16 }
  0xd2   :  { %v143_v18 = vshrl.u32 %v142_v17, 30 }
  0xd4   :  { %v144_v19 = vshll.u32 %v143_v18, 30  ;;  %v167_v40 = vsub.s32 4, %v143_v18 }
  0xd6   :  { %v145_v20 = vsub.s32 %v141_v16, %v144_v19  ;;  %v168_v43 = vsel %vm83_vm7, %v167_v40, %v143_v18 }
  0xd7   :  { %v170_v45 = vsel %vm82_vm8, 0, %v168_v43 }
  0xd8   :  { %v147_v21 = vsub.s32 0, %v145_v20  ;;  %v277_v46 = vadd.s32 3, %v170_v45  ;;  %v174_v47 = vand.u32 3, %v170_v45 }
  0xda   :  { %v316_v22 = vmin.u32 %v147_v21, %v145_v20  ;;  %v278_v48 = vand.u32 3, %v277_v46  ;;  %vm179_vm9 = vcmp.eq.s32.totalorder %v174_v47, 2  ;;  %vm176_vm11 = vcmp.eq.s32.totalorder %v174_v47, 0 }
  0xdb   :  { %vm175_vm13 = vcmp.lt.s32.totalorder %v174_v47, 2 }
  0xdc   :  { %v149_v23 = vclz %v316_v22  ;;  %vm283_vm10 = vcmp.eq.s32.totalorder %v278_v48, 2  ;;  %vm280_vm12 = vcmp.eq.s32.totalorder %v278_v48, 0  ;;  %vm279_vm14 = vcmp.lt.s32.totalorder %v278_v48, 2 }
  0xde   :  { %v317_v24 = vadd.s32 4294967294, %v149_v23 }
  0xe0   :  { %vm318_vm6 = vcmp.lt.s32.totalorder %v317_v24, 0 }
  0xe1   :  { %v152_v25 = vsel %vm318_vm6, 0, %v317_v24 }
  0xe2   :  { %v153_v28 = vsub.s32 32, %v152_v25  ;;  %v157_v29 = vsub.s32 4294967266, %v152_v25  ;;  %v154_v30 = vshll.u32 %v145_v20, %v152_v25 }
  0xe4   :  { %v155_v32 = vshrl.u32 %v137_v27, %v153_v28  ;;  %v158_v33 = vadd.s32 127, %v157_v29 }
  0xe6   :  { %v156_v34 = vor.u32 %v155_v32, %v154_v30  ;;  %v159_v35 = vshll.u32 %v158_v33, 23 }
  0xe8   :  { %v160_v36 = vor.u32 4788187, %v159_v35  ;;  %v163_v38 = vcvt.s32.f32 %v156_v34 }
  0xea   :  { %v161_v37 = vand.u32 2147483647, %v160_v36 }
  0xec   :  { %v164_v39 = vmul.f32 %v163_v38, %v161_v37 }
  0xee   :  { %v165_v41 = vxor.u32 2147483648, %v164_v39 }
  0xf0   :  { %v166_v42 = vsel %vm83_vm7, %v165_v41, %v164_v39 }
  0xf1   :  { %v169_v44 = vsel %vm82_vm8, %v479_v26, %v166_v42 }
  0xf2   :  { %346 = vcosq.f32 %v169_v44 }
  0xf3   :  { %348 = vsinq.f32 %v169_v44 }
  0xfc   :  { %v347_v49 = vpop.eup %346 }
  0xfd   :  { %v349_v50 = vpop.eup %348  ;;  %v180_v51 = vxor.u32 2147483648, %v347_v49 }
  0xfe   :  { %v177_v52 = vxor.u32 2147483648, %v349_v50 }
  0xff   :  { %v181_v53 = vsel %vm179_vm9, %v180_v51, %v349_v50  ;;  %v285_v54 = vsel %vm283_vm10, %v180_v51, %v349_v50 }
 0x100   :  { %v178_v31 = vsel %vm176_vm11, %v347_v49, %v177_v52  ;;  %v282_v55 = vsel %vm280_vm12, %v347_v49, %v177_v52 }
 0x101   :  { %v182_v56 = vsel %vm175_vm13, %v178_v31, %v181_v53  ;;  %v286_v57 = vsel %vm279_vm14, %v282_v55, %v285_v54 }
 0x102   :  { %v183_v58 = vsel %vm173_vm15, nan, %v182_v56  ;;  %v287_v59 = vsel %vm173_vm15, nan, %v286_v57 }
 0x103   :  { %v289_v61 = vsub.f32 %v287_v59, %v183_v58 }
 0x105   :  { %v296_v62 = vmul.f32 %v323_v60, %v289_v61 }
 0x107   :  { %v297_v63 = vadd.f32 %v296_v62, %v183_v58 }
 0x109   :  { %298 = vst [vmem:[#allocation7] sm:$0x3] %v297_v63 }
 0x10a   :  { %405 = shalt.err (!%p402_p6)
}
 0x10b   :  { %s406_s14 = scalar_lea.hbm %s518_s3, 32 }
 0x10c   :  { %p407_p7 = scmp.ne.s32.totalorder %s518_s3, %s406_s14  ;;  %p410_p8 = scmp.lt.u32.totalorder %s406_s14, %s518_s3 }
 0x10e   :  { %p412_p9 = pnand %p410_p8, %p407_p7 }
 0x110   :  { %415 = shalt.err (!%p412_p9)
}
 0x111   :  { %308 = dma.vmem_to_hbm [thread:$0]  %s306_s10, 32, %s518_s3, [#allocation4]  }
 0x112   :  { %420 = dma.done.wait [#allocation4], 32  }
 0x113   :  { %421 = vsyncadd [#allocation4], 4294967264 }
 0x114   :  { %312 = vsyncpa [#allocation3], 1 }
 0x115   :  { %313 = vsyncpa [#allocation6], 1 }
 0x116   :  { %314 = vsyncpa [#allocation4], 1 }

</bundles_post_ra>
